<compile_context>
chip_gen: v7x
topology: tpu7x:2x2x1
jax: 0.10.0
libtpu: 0.0.40
codegen_flags: <defaults>
</compile_context>

<pallas_src>
import functools

import jax
import jax.numpy as jnp
import numpy as np
from jax.experimental import pallas as pl
from jax.experimental.pallas import tpu as pltpu


def coattention_kernel(x_ref, w_ref, b_ref, c_ref, m_ref, out_ref, a_ref, *,
                       mxu_dtype):
    Bt, S, F = x_ref.shape
    x = x_ref[...]                                       # (Bt, S, F) f32
    xc = x.astype(mxu_dtype)
    w = w_ref[...].astype(mxu_dtype)                     # (F, F)

    # (1) xw = x @ W, folded across the batch block: (Bt*S, F) @ (F, F).
    #     S is a multiple of 8, so the collapse/split reshapes are layout-free.
    xw = jnp.dot(xc.reshape(Bt * S, F), w, preferred_element_type=jnp.float32)
    xw = xw.reshape(Bt, S, F).astype(mxu_dtype)

    # (2) e_t[b, t, s] = sum_f x[b, t, f] * xw[b, s, f]  ==  (x_b @ W @ x_b^T)^T
    #     computed directly in transposed orientation so s lands on lanes.
    e_t = jnp.einsum("btf,bsf->bts", xc, xw, preferred_element_type=jnp.float32)

    # bias[t] and context[t] broadcast along lanes (t is the sublane axis here).
    e_t = jnp.tanh(e_t + b_ref[...])                     # b_ref: (S, 1)

    # (3) scores[b, s] = sum_t tanh(e)[b, t, s] * context[t]
    #     VPU multiply + sublane reduction instead of an N=1 MXU matmul.
    scores = jnp.sum(e_t * c_ref[...], axis=1, keepdims=True)    # (Bt, 1, S)

    a = 1.0 / (1.0 + jnp.exp(-scores))                   # sigmoid (EUP exp + divide)
    a = a * m_ref[...]                                   # multiplicative mask
    a_ref[...] = a                                       # lane-dense attention store

    # (4) pooled[b, f] = sum_s a[b, s] * x[b, s, f]  -> batched (1, S) @ (S, F).
    out_ref[...] = jnp.einsum("bks,bsf->bkf", a, x,
                              preferred_element_type=jnp.float32)


def _pick_batch_block(B, S):
    # Enough rows (Bt*S >= ~256) per grid step to feed the MXU and amortize the
    # ~0.35 us/step pipeline overhead, while keeping the VMEM working set small.
    target = max(1, 256 // max(S, 1))
    return B if B <= target else target


def coattention_lbsa_sigmoid(x, weight, bias, context, mask=None,
                             mxu_dtype=jnp.float32):
    """x: (B, S, F); weight: (F, F); bias: (S,); context: (S, 1); mask: (B, S) or None."""
    B, S, F = x.shape
    x = x.astype(jnp.float32)
    weight = weight.astype(jnp.float32)
    b_col = bias.reshape(S, 1).astype(jnp.float32)       # indexed by t, broadcast on lanes
    c_col = context.reshape(S, 1).astype(jnp.float32)    # indexed by t, broadcast on lanes
    if mask is None:
        m = jnp.ones((B, S), jnp.float32)
    else:
        m = mask.astype(jnp.float32).reshape(B, S)
    m3 = m.reshape(B, 1, S)                              # lane-dense mask layout

    Bt = _pick_batch_block(B, S)
    n_blocks = pl.cdiv(B, Bt)
    B_pad = n_blocks * Bt
    if B_pad != B:
        x = jnp.pad(x, ((0, B_pad - B), (0, 0), (0, 0)))
        m3 = jnp.pad(m3, ((0, B_pad - B), (0, 0), (0, 0)))

    kernel = functools.partial(coattention_kernel, mxu_dtype=mxu_dtype)

    pooled3, attn3 = pl.pallas_call(
        kernel,
        out_shape=(
            jax.ShapeDtypeStruct((B_pad, 1, F), jnp.float32),
            jax.ShapeDtypeStruct((B_pad, 1, S), jnp.float32),
        ),
        grid=(n_blocks,),
        in_specs=[
            pl.BlockSpec((Bt, S, F), lambda i: (i, 0, 0)),    # x
            pl.BlockSpec((F, F), lambda i: (0, 0)),           # weight
            pl.BlockSpec((S, 1), lambda i: (0, 0)),           # bias column (over t)
            pl.BlockSpec((S, 1), lambda i: (0, 0)),           # context column (over t)
            pl.BlockSpec((Bt, 1, S), lambda i: (i, 0, 0)),    # mask, lane-dense
        ],
        out_specs=(
            pl.BlockSpec((Bt, 1, F), lambda i: (i, 0, 0)),    # pooled
            pl.BlockSpec((Bt, 1, S), lambda i: (i, 0, 0)),    # attention, lane-dense
        ),
        compiler_params=pltpu.CompilerParams(
            dimension_semantics=("parallel",)),
    )(x, weight, b_col, c_col, m3)

    return pooled3[:B, 0, :], attn3[:B, 0, :]


def ref_forward(x, weight, bias, context, mask=None):
    """Pure-JAX reference mirroring the PyTorch forward (sigmoid attention)."""
    e = jnp.einsum("bsf,fg,btg->bst", x, weight, x)
    e = jnp.tanh(e + bias[None, None, :])
    s = jnp.einsum("bst,t->bs", e, context[:, 0])
    a = jax.nn.sigmoid(s)
    if mask is not None:
        a = a * mask.astype(a.dtype)
    pooled = jnp.sum(x * a[:, :, None], axis=1)
    return pooled, a


if __name__ == "__main__":
    B = 2          # batch
    S = 8          # step_dim (sequence length)
    F = 32         # feature_dim

    key = jax.random.PRNGKey(0)
    kx, kw, kc, kb = jax.random.split(key, 4)

    x = jax.random.normal(kx, (B, S, F), dtype=jnp.float32)

    # xavier_uniform_ for weight (F, F): bound = sqrt(6 / (F + F))
    w_bound = float(np.sqrt(6.0 / (F + F)))
    weight = jax.random.uniform(kw, (F, F), jnp.float32, -w_bound, w_bound)

    # xavier_uniform_ for context (S, 1): fan_in = 1, fan_out = S
    c_bound = float(np.sqrt(6.0 / (1 + S)))
    context = jax.random.uniform(kc, (S, 1), jnp.float32, -c_bound, c_bound)

    # bias is a learnable (S,) parameter; use a small nonzero value so the
    # broadcast orientation is actually exercised by the self-check.
    bias = 0.1 * jax.random.normal(kb, (S,), dtype=jnp.float32)

    # deterministic 0/1 mask: batch 0 keeps all steps, batch 1 masks the last 3
    lengths = jnp.array([[S], [S - 3]], dtype=jnp.int32)
    mask = (jnp.arange(S, dtype=jnp.int32)[None, :] < lengths).astype(jnp.float32)

    pooled, attn = coattention_lbsa_sigmoid(x, weight, bias, context, mask)
    jax.block_until_ready((pooled, attn))

    pooled_ref, attn_ref = ref_forward(x, weight, bias, context, mask)

    np.testing.assert_allclose(np.asarray(pooled), np.asarray(pooled_ref),
                               rtol=1e-4, atol=5e-4)
    np.testing.assert_allclose(np.asarray(attn), np.asarray(attn_ref),
                               rtol=1e-4, atol=5e-4)

    print("KERNEL_OK")
</pallas_src>

<mosaic_0001>
module attributes {stable_mosaic.version = 11 : i64} {
  func.func @coattention_kernel(%arg0: i32, %arg1: memref<2x8x32xf32, #tpu.memory_space<vmem>>, %arg2: memref<32x32xf32, #tpu.memory_space<vmem>>, %arg3: memref<8x1xf32, #tpu.memory_space<vmem>>, %arg4: memref<8x1xf32, #tpu.memory_space<vmem>>, %arg5: memref<2x1x8xf32, #tpu.memory_space<vmem>>, %arg6: memref<2x1x32xf32, #tpu.memory_space<vmem>>, %arg7: memref<2x1x8xf32, #tpu.memory_space<vmem>>) attributes {dimension_semantics = [#tpu.dimension_semantics<parallel>], iteration_bounds = array<i64: 1>, scalar_prefetch = 0 : i64, scratch_operands = 0 : i64, tpu.core_type = #tpu.core_type<tc>, window_params = [{transform_indices = @transform_0, window_bounds = array<i64: 2, 8, 32>}, {pipeline_mode = #tpu.pipeline_mode<synchronous>, transform_indices = @transform_1, window_bounds = array<i64: 32, 32>}, {pipeline_mode = #tpu.pipeline_mode<synchronous>, transform_indices = @transform_2, window_bounds = array<i64: 8, 1>}, {pipeline_mode = #tpu.pipeline_mode<synchronous>, transform_indices = @transform_3, window_bounds = array<i64: 8, 1>}, {transform_indices = @transform_4, window_bounds = array<i64: 2, 1, 8>}, {transform_indices = @transform_5, window_bounds = array<i64: 2, 1, 32>}, {transform_indices = @transform_6, window_bounds = array<i64: 2, 1, 8>}]} {
    %c0 = arith.constant 0 : index
    %c0_0 = arith.constant 0 : index
    %c0_1 = arith.constant 0 : index
    %0 = vector.load %arg1[%c0, %c0_0, %c0_1] : memref<2x8x32xf32, #tpu.memory_space<vmem>>, vector<2x8x32xf32>
    %c0_2 = arith.constant 0 : index
    %c0_3 = arith.constant 0 : index
    %1 = vector.load %arg2[%c0_2, %c0_3] : memref<32x32xf32, #tpu.memory_space<vmem>>, vector<32x32xf32>
    %2 = vector.shape_cast %0 : vector<2x8x32xf32> to vector<16x32xf32>
    %cst = arith.constant dense<0.000000e+00> : vector<16x32xf32>
    %3 = tpu.matmul %2, %1, %cst {dimension_numbers = #tpu.dot_dimension_numbers<[1], [0], [0], [1], [0, 0, 1, 1], [], []>} : vector<16x32xf32>, vector<32x32xf32>, vector<16x32xf32> -> vector<16x32xf32>
    %4 = vector.shape_cast %3 : vector<16x32xf32> to vector<2x8x32xf32>
    "tpu.trace_start"() <{level = 10 : i32, message = "btf,bsf->bts"}> : () -> ()
    %cst_4 = arith.constant dense<0.000000e+00> : vector<2x8x8xf32>
    %5 = tpu.matmul %0, %4, %cst_4 {dimension_numbers = #tpu.dot_dimension_numbers<[2], [2], [1], [1], [0, 0, 0, 1, 1, 1], [0], [0]>} : vector<2x8x32xf32>, vector<2x8x32xf32>, vector<2x8x8xf32> -> vector<2x8x8xf32>
    "tpu.trace_stop"() : () -> ()
    %c0_5 = arith.constant 0 : index
    %c0_6 = arith.constant 0 : index
    %6 = vector.load %arg3[%c0_5, %c0_6] : memref<8x1xf32, #tpu.memory_space<vmem>>, vector<8x1xf32>
    %7 = vector.shape_cast %6 : vector<8x1xf32> to vector<1x8x1xf32>
    %8 = vector.broadcast %7 : vector<1x8x1xf32> to vector<2x8x8xf32>
    %9 = arith.addf %5, %8 : vector<2x8x8xf32>
    %10 = math.tanh %9 : vector<2x8x8xf32>
    %c0_7 = arith.constant 0 : index
    %c0_8 = arith.constant 0 : index
    %11 = vector.load %arg4[%c0_7, %c0_8] : memref<8x1xf32, #tpu.memory_space<vmem>>, vector<8x1xf32>
    %12 = vector.shape_cast %11 : vector<8x1xf32> to vector<1x8x1xf32>
    %13 = vector.broadcast %12 : vector<1x8x1xf32> to vector<2x8x8xf32>
    %14 = arith.mulf %10, %13 : vector<2x8x8xf32>
    %cst_9 = arith.constant dense<0.000000e+00> : vector<2x8xf32>
    %15 = vector.multi_reduction <add>, %14, %cst_9 [1] : vector<2x8x8xf32> to vector<2x8xf32>
    %16 = vector.shape_cast %15 : vector<2x8xf32> to vector<2x1x8xf32>
    %cst_10 = arith.constant 0.000000e+00 : f32
    %17 = vector.broadcast %cst_10 : f32 to vector<2x1x8xf32>
    %18 = arith.subf %17, %16 : vector<2x1x8xf32>
    %19 = math.exp %18 : vector<2x1x8xf32>
    %cst_11 = arith.constant 1.000000e+00 : f32
    %20 = vector.broadcast %cst_11 : f32 to vector<2x1x8xf32>
    %21 = arith.addf %20, %19 : vector<2x1x8xf32>
    %cst_12 = arith.constant 1.000000e+00 : f32
    %22 = vector.broadcast %cst_12 : f32 to vector<2x1x8xf32>
    %23 = arith.divf %22, %21 : vector<2x1x8xf32>
    %c0_13 = arith.constant 0 : index
    %c0_14 = arith.constant 0 : index
    %c0_15 = arith.constant 0 : index
    %24 = vector.load %arg5[%c0_13, %c0_14, %c0_15] : memref<2x1x8xf32, #tpu.memory_space<vmem>>, vector<2x1x8xf32>
    %25 = arith.mulf %23, %24 : vector<2x1x8xf32>
    %c0_16 = arith.constant 0 : index
    %c0_17 = arith.constant 0 : index
    %c0_18 = arith.constant 0 : index
    %26 = vector.load %arg7[%c0_16, %c0_17, %c0_18] : memref<2x1x8xf32, #tpu.memory_space<vmem>>, vector<2x1x8xf32>
    tpu.vector_store %arg7[%c0_16, %c0_17, %c0_18], %25 {strides = array<i32>} : memref<2x1x8xf32, #tpu.memory_space<vmem>>, vector<2x1x8xf32>,
    "tpu.trace_start"() <{level = 10 : i32, message = "bks,bsf->bkf"}> : () -> ()
    %cst_19 = arith.constant dense<0.000000e+00> : vector<2x1x32xf32>
    %27 = tpu.matmul %25, %0, %cst_19 {dimension_numbers = #tpu.dot_dimension_numbers<[2], [1], [1], [2], [0, 0, 0, 1, 1, 2], [0], [0]>} : vector<2x1x8xf32>, vector<2x8x32xf32>, vector<2x1x32xf32> -> vector<2x1x32xf32>
    "tpu.trace_stop"() : () -> ()
    %c0_20 = arith.constant 0 : index
    %c0_21 = arith.constant 0 : index
    %c0_22 = arith.constant 0 : index
    %28 = vector.load %arg6[%c0_20, %c0_21, %c0_22] : memref<2x1x32xf32, #tpu.memory_space<vmem>>, vector<2x1x32xf32>
    tpu.vector_store %arg6[%c0_20, %c0_21, %c0_22], %27 {strides = array<i32>} : memref<2x1x32xf32, #tpu.memory_space<vmem>>, vector<2x1x32xf32>,
    return
  }
  func.func @transform_0(%arg0: i32) -> (i32, i32, i32) {
    %c0_i32 = arith.constant 0 : i32
    %c0_i32_0 = arith.constant 0 : i32
    %c0_i32_1 = arith.constant 0 : i32
    return %arg0, %c0_i32, %c0_i32_0 : i32, i32, i32
  }
  func.func @transform_1(%arg0: i32) -> (i32, i32) {
    %c0_i32 = arith.constant 0 : i32
    %c0_i32_0 = arith.constant 0 : i32
    %c0_i32_1 = arith.constant 0 : i32
    return %c0_i32, %c0_i32_0 : i32, i32
  }
  func.func @transform_2(%arg0: i32) -> (i32, i32) {
    %c0_i32 = arith.constant 0 : i32
    %c0_i32_0 = arith.constant 0 : i32
    %c0_i32_1 = arith.constant 0 : i32
    return %c0_i32, %c0_i32_0 : i32, i32
  }
  func.func @transform_3(%arg0: i32) -> (i32, i32) {
    %c0_i32 = arith.constant 0 : i32
    %c0_i32_0 = arith.constant 0 : i32
    %c0_i32_1 = arith.constant 0 : i32
    return %c0_i32, %c0_i32_0 : i32, i32
  }
  func.func @transform_4(%arg0: i32) -> (i32, i32, i32) {
    %c0_i32 = arith.constant 0 : i32
    %c0_i32_0 = arith.constant 0 : i32
    %c0_i32_1 = arith.constant 0 : i32
    return %arg0, %c0_i32, %c0_i32_0 : i32, i32, i32
  }
  func.func @transform_5(%arg0: i32) -> (i32, i32, i32) {
    %c0_i32 = arith.constant 0 : i32
    %c0_i32_0 = arith.constant 0 : i32
    %c0_i32_1 = arith.constant 0 : i32
    return %arg0, %c0_i32, %c0_i32_0 : i32, i32, i32
  }
  func.func @transform_6(%arg0: i32) -> (i32, i32, i32) {
    %c0_i32 = arith.constant 0 : i32
    %c0_i32_0 = arith.constant 0 : i32
    %c0_i32_1 = arith.constant 0 : i32
    return %arg0, %c0_i32, %c0_i32_0 : i32, i32, i32
  }
}

</mosaic_0001>

<bundles_post_ra>
// kernel: tpu_custom_call.1
= control target key start
LH: loop header
LB: loop body
LE: loop exit
PB: predicated region body
PF: predicated region fallthrough
CT: control target
= control target key end

     0   :  { %12 = vsyncpa [#allocation3], 0  ;;  %s773_s0 = inlined_call_operand.vmem [shape: f32[2,8,32], index: 0, kind: input, shape index: {}]   ;;  %s774_s1 = inlined_call_operand.hbm [shape: f32[32,32], index: 1, kind: input, shape index: {}]   ;;  %s775_s2 = inlined_call_operand.vmem [shape: f32[8,1], index: 2, kind: input, shape index: {}]   ;;  %s776_s3 = inlined_call_operand.vmem [shape: f32[8,1], index: 3, kind: input, shape index: {}]   ;;  %s777_s4 = inlined_call_operand.vmem [shape: f32[2,1,8], index: 4, kind: input, shape index: {}]   ;;  %s778_s5 = inlined_call_operand.hbm [shape: f32[2,1,32], index: 5, kind: output, shape index: {0}]   ;;  %s779_s6 = inlined_call_operand.hbm [shape: f32[2,1,8], index: 6, kind: output, shape index: {1}]  }
   0x1   :  { %13 = vsyncpa [#allocation4], 0 }
   0x2   :  { %14 = vsyncpa [#allocation7], 0  ;;  %s660_s21 = smov [#allocation2]   ;;  %s588_s25 = scalar_lea.hbm %s774_s1, 512 }
   0x3   :  { %s22_s22 = sshll.u32 %s660_s21, 4  ;;  %p589_p0 = scmp.ne.s32.totalorder %s774_s1, %s588_s25  ;;  %s23_s22 = int_to_ptr.vmem [resolvable:$true] %s22_s22 }
   0x4   :  { %p592_p1 = scmp.lt.u32.totalorder %s588_s25, %s774_s1 }
   0x6   :  { %p594_p2 = pnand %p592_p1, %p589_p0 }
   0x8   :  { %597 = shalt.err (!%p594_p2)
}
   0x9   :  { %s598_s30 = scalar_lea.vmem %s23_s22, 512  ;;  %p603_p4 = scmp.lt.s32.totalorder %s23_s22, %s23_s22 }
   0xa   :  { %p599_p3 = scmp.ne.s32.totalorder %s23_s22, %s598_s30  ;;  %p604_p5 = scmp.lt.s32.totalorder %s598_s30, %s598_s30 }
   0xc   :  { %p605_p6 = por %p604_p5, %p603_p4 }
   0xe   :  { %p606_p7 = pnand %p605_p6, %p599_p3 }
  0x10   :  { %609 = shalt.err (!%p606_p7)
}
  0x11   :  { %s661_s7 = smov 128   ;;  %s662_s8 = smov 8  }
  0x12   :  { %28 = dma.hbm_to_vmem [thread:$0]  %s774_s1, 512, %s23_s22, [#allocation3], %s661_s7, %s661_s7, %s662_s8  }
  0x13   :  { %654 = dma.done.wait [#allocation3], 512  }
  0x14   :  { %655 = vsyncadd [#allocation3], 4294966784  ;;  %vm44_vm0 = vcmask 261120   ;;  %v40_v0 = vld [vmem:[#allocation2] sm:$0xff]  ;;  %v41_v1 = vld [vmem:[#allocation2 + $0x8] sm:$0xff]  ;;  %v663_v8 = vmov 0.0  }
  0x15   :  { %v42_v2 = vld [vmem:[#allocation2 + $0x10] sm:$0xff]  ;;  %v557_v3 = vpack.c.bf16 %v41_v1, %v40_v0  ;;  %v43_v4 = vld [vmem:[#allocation2 + $0x18] sm:$0xff]  ;;  %v38_v5 = vld [vmem:[%s773_s0] sm:$0xff]  ;;  %537 = vmatprep.subr.mxu1 %v663_v8  ;;  %vm664_vm1 = vmmov 0   ;;  %v665_v10 = vmov 0   ;;  %vm288_vm2 = vcmask 64512  }
  0x16   :  { %v561_v6 = vpack.c.bf16 %v43_v4, %v42_v2  ;;  %534 = vmatprep.mubr.msk.f32.mxu0 %vm44_vm0, %v38_v5  ;;  %v39_v7 = vld [vmem:[%s773_s0 + $0x8] sm:$0xff]  ;;  %539 = vmatprep.mubr.msk.f32.mxu1 %vm664_vm1, %v663_v8  ;;  %v126_v9 = vld [vmem:[%s775_s2] sm:$0xff]  ;;  %vm319_vm3 = vcmask 57344   ;;  %s666_s19 = smov [#allocation6]  }
  0x17   :  { %558 = vmatprep.subr.bf16.mxu0 %v557_v3  ;;  %575 = vset.pattern.permute.xlu0 %v665_v10  ;;  %v280_v11 = vld [vmem:[%s776_s3] sm:$0xff]  ;;  %s488_s20 = sshll.u32 %s666_s19, 4  ;;  %s489_s20 = int_to_ptr.vmem [resolvable:$true] %s488_s20 }
  0x18   :  { %560 = vmatpush3.bf16.msra.mxu0 %v557_v3  ;;  %129 = vperm.xlu0 %575, %v126_v9   ;;  %v315_v48 = vld [vmem:[%s777_s4] sm:$0x1]  ;;  %v316_v51 = vld [vmem:[%s777_s4 + $0x1] sm:$0x1]  ;;  %s610_s21 = scalar_lea.vmem %s489_s20, 32  ;;  %p615_p9 = scmp.lt.s32.totalorder %s489_s20, %s489_s20 }
  0x19   :  { %562 = vmatprep.subr.bf16.mxu0 %v561_v6  ;;  %p611_p8 = scmp.ne.s32.totalorder %s489_s20, %s610_s21  ;;  %p616_p10 = scmp.lt.s32.totalorder %s610_s21, %s610_s21 }
  0x1b   :  { %p617_p11 = por %p616_p10, %p615_p9 }
  0x1c   :  { %564 = vmatpush3.bf16.msra.mxu0 %v561_v6  ;;  %283 = vperm.xlu0 %575, %v280_v11  }
  0x1d   :  { %547 = vmatprep.subr.mxu0 %v663_v8  ;;  %p618_p12 = pnand %p617_p11, %p611_p8 }
  0x1f   :  { %535 = vmatmul.mubr.msk.f32.vlgmr.msra.gmra.mrb[0].mxu0 %vm44_vm0, %v39_v7 }
  0x20   :  { %548 = vmatpush3.msra.mxu0 %v38_v5  ;;  %549 = vmatprep.mubr.msk.f32.mxu0 %vm664_vm1, %v663_v8 }
  0x97   :  { %v130_v14 = vpop.permute.xlu0 %129 }
  0x9b   :  { %v284_v22 = vpop.permute.xlu0 %283 }
  0xf2   :  { %v536_v12 = vpop.f32.mrb[0].mxu0 }
  0xf3   :  { %v117_v13 = vpop.f32.mrb[1].mxu0 }
  0xf4   :  { %538 = vmatpush3.xpose.msk.msra.mxu1 %vm44_vm0, %v117_v13 }
  0xf5   :  { %542 = vmatprep.subr.mxu1 %v663_v8 }
  0xf7   :  { %540 = vmatmul.mubr.msk.f32.vlgmr.msra.gmra.mrb[0].mxu1 %vm44_vm0, %v38_v5 }
  0xf8   :  { %543 = vmatpush3.xpose.msk.msra.mxu1 %vm44_vm0, %v536_v12  ;;  %544 = vmatprep.mubr.msk.f32.mxu1 %vm664_vm1, %v663_v8 }
  0xf9   :  { %552 = vmatprep.subr.mxu1 %v663_v8 }
  0xfb   :  { %545 = vmatmul.mubr.msk.f32.vlgmr.msra.gmra.mrb[2].mxu1 %vm44_vm0, %v39_v7 }
  0xfc   :  { %553 = vmatpush3.msra.mxu1 %v39_v7  ;;  %554 = vmatprep.mubr.msk.f32.mxu1 %vm664_vm1, %v663_v8 }
 0x1ca   :  { %v201_v15 = vpop.f32.mrb[0].mxu1 }
 0x1cb   :  { %v202_v16 = vadd.f32 %v201_v15, %v130_v14  ;;  %v541_v17 = vpop.f32.mrb[1].mxu1 }
 0x1cd   :  { %576 = vtanh.f32 %v202_v16 }
 0x1ce   :  { %v274_v18 = vpop.f32.mrb[2].mxu1 }
 0x1cf   :  { %v275_v19 = vadd.f32 %v274_v18, %v130_v14  ;;  %v546_v20 = vpop.f32.mrb[3].mxu1 }
 0x1d1   :  { %578 = vtanh.f32 %v275_v19 }
 0x1d7   :  { %v577_v21 = vpop.eup %576 }
 0x1d8   :  { %v286_v23 = vmul.f32 %v577_v21, %v284_v22 }
 0x1da   :  { %v289_v24 = vsel %vm288_vm2, %v286_v23, 0.0 }
 0x1db   :  { %v579_v25 = vpop.eup %578  ;;  %v290_v26 = vrot.slane %v289_v24, 4 }
 0x1dc   :  { %v287_v27 = vmul.f32 %v579_v25, %v284_v22 }
 0x1dd   :  { %v291_v28 = vadd.f32 %v290_v26, %v289_v24 }
 0x1de   :  { %v296_v29 = vsel %vm288_vm2, %v287_v27, 0.0 }
 0x1df   :  { %v292_v30 = vrot.slane %v291_v28, 2  ;;  %v297_v31 = vrot.slane %v296_v29, 4 }
 0x1e1   :  { %v293_v32 = vadd.f32 %v292_v30, %v291_v28  ;;  %v298_v33 = vadd.f32 %v297_v31, %v296_v29 }
 0x1e3   :  { %v294_v34 = vrot.slane %v293_v32, 1  ;;  %v299_v35 = vrot.slane %v298_v33, 2 }
 0x1e5   :  { %v295_v36 = vadd.f32 %v294_v34, %v293_v32  ;;  %v300_v37 = vadd.f32 %v299_v35, %v298_v33 }
 0x1e7   :  { %v301_v38 = vrot.slane %v300_v37, 1  ;;  %v303_v39 = vsub.f32 0.0, %v295_v36 }
 0x1e9   :  { %v302_v40 = vadd.f32 %v301_v38, %v300_v37  ;;  %v305_v41 = vmul.f32 1.442695, %v303_v39 }
 0x1eb   :  { %v304_v42 = vsub.f32 0.0, %v302_v40  ;;  %580 = vpow2.f32 %v305_v41 }
 0x1ed   :  { %v307_v43 = vmul.f32 1.442695, %v304_v42 }
 0x1ef   :  { %582 = vpow2.f32 %v307_v43 }
 0x1f5   :  { %v581_v44 = vpop.eup %580 }
 0x1f6   :  { %v309_v45 = vadd.f32 1.0, %v581_v44 }
 0x1f8   :  { %584 = vrcp.f32 %v309_v45 }
 0x1f9   :  { %v583_v46 = vpop.eup %582 }
 0x1fa   :  { %v310_v47 = vadd.f32 1.0, %v583_v46 }
 0x1fc   :  { %586 = vrcp.f32 %v310_v47 }
 0x202   :  { %v585_v49 = vpop.eup %584 }
 0x203   :  { %v317_v50 = vmul.f32 %v585_v49, %v315_v48 }
 0x205   :  { %550 = vmatmul.mubr.msk.f32.vlgmr.msra.gmra.mrb[2].mxu0 %vm288_vm2, %v317_v50  ;;  %320 = vst.msk [vmem:[#allocation6] sm:$0x1] %vm319_vm3, %v317_v50 }
 0x206   :  { %v587_v52 = vpop.eup %586 }
 0x207   :  { %v318_v53 = vmul.f32 %v587_v52, %v316_v51 }
 0x209   :  { %555 = vmatmul.mubr.msk.f32.vlgmr.msra.gmra.mrb[4].mxu1 %vm288_vm2, %v318_v53  ;;  %321 = vst.msk [vmem:[#allocation6 + $0x1] sm:$0x1] %vm319_vm3, %v318_v53 }
 0x20a   :  { %621 = shalt.err (!%p618_p12)
}
 0x20b   :  { %s622_s23 = scalar_lea.hbm %s779_s6, 32 }
 0x20c   :  { %p623_p13 = scmp.ne.s32.totalorder %s779_s6, %s622_s23  ;;  %p626_p0 = scmp.lt.u32.totalorder %s622_s23, %s779_s6 }
 0x20e   :  { %p628_p1 = pnand %p626_p0, %p623_p13 }
 0x210   :  { %631 = shalt.err (!%p628_p1)
}
 0x211   :  { %s667_s28 = smov 16   ;;  %s668_s29 = smov 1   ;;  %vm468_vm4 = vcmask 253952  }
 0x212   :  { %494 = dma.vmem_to_hbm [thread:$0]  %s489_s20, 32, %s779_s6, [#allocation7], %s667_s28, %s667_s28, %s668_s29  }
 0x213   :  { %s669_s8 = smov [#allocation5]  }
 0x214   :  { %s476_s9 = sshll.u32 %s669_s8, 4  ;;  %s477_s9 = int_to_ptr.vmem [resolvable:$true] %s476_s9 }
 0x215   :  { %s632_s10 = scalar_lea.vmem %s477_s9, 32  ;;  %p637_p3 = scmp.lt.s32.totalorder %s477_s9, %s477_s9 }
 0x216   :  { %p633_p2 = scmp.ne.s32.totalorder %s477_s9, %s632_s10  ;;  %p638_p4 = scmp.lt.s32.totalorder %s632_s10, %s632_s10 }
 0x218   :  { %p639_p5 = por %p638_p4, %p637_p3 }
 0x21a   :  { %p640_p6 = pnand %p639_p5, %p633_p2 }
 0x2d8   :  { %v391_v54 = vpop.f32.mrb[2].mxu0 }
 0x2d9   :  { %469 = vst.msk [vmem:[#allocation5] sm:$0x1] %vm468_vm4, %v391_v54  ;;  %v551_v55 = vpop.f32.mrb[3].mxu0 }
 0x2dc   :  { %v464_v56 = vpop.f32.mrb[4].mxu1 }
 0x2dd   :  { %470 = vst.msk [vmem:[#allocation5 + $0x1] sm:$0x1] %vm468_vm4, %v464_v56  ;;  %v556_v57 = vpop.f32.mrb[5].mxu1 }
 0x2de   :  { %643 = shalt.err (!%p640_p6)
}
 0x2df   :  { %s644_s6 = scalar_lea.hbm %s778_s5, 32 }
 0x2e0   :  { %p645_p7 = scmp.ne.s32.totalorder %s778_s5, %s644_s6  ;;  %p648_p8 = scmp.lt.u32.totalorder %s644_s6, %s778_s5 }
 0x2e2   :  { %p650_p9 = pnand %p648_p8, %p645_p7 }
 0x2e4   :  { %653 = shalt.err (!%p650_p9)
}
 0x2e5   :  { %482 = dma.vmem_to_hbm [thread:$0]  %s477_s9, 32, %s778_s5, [#allocation4], %s667_s28, %s667_s28, %s668_s29  }
 0x2e6   :  { %656 = dma.done.wait [#allocation4], 32  }
 0x2e7   :  { %657 = vsyncadd [#allocation4], 4294967264 }
 0x2e8   :  { %658 = dma.done.wait [#allocation7], 32  }
 0x2e9   :  { %659 = vsyncadd [#allocation7], 4294967264 }
 0x2ea   :  { %501 = vsyncpa [#allocation3], 1 }
 0x2eb   :  { %502 = vsyncpa [#allocation4], 1 }
 0x2ec   :  { %503 = vsyncpa [#allocation7], 1 }

</bundles_post_ra>
